<compile_context>
chip_gen: v5e
topology: v5e:2x2
jax: 0.10.0
libtpu: 0.0.40
codegen_flags: <defaults>
</compile_context>

<pallas_src>
import functools

import jax
import jax.numpy as jnp
from jax import lax
from jax.experimental import pallas as pl
from jax.experimental.pallas import tpu as pltpu


def _round_up(x, m):
    return (x + m - 1) // m * m


def _cdiv(a, b):
    return (a + b - 1) // b


def _multitask_kernel(x_ref, w1_ref, b1_ref, wh_ref, bh_ref, o_ref, *, o1):
    # Shared encoder: Linear + ReLU (bf16 MXU matmul, f32 accumulation).
    h = jnp.dot(x_ref[...], w1_ref[...], preferred_element_type=jnp.float32)
    h = jnp.maximum(h + b1_ref[...], 0.0)

    # Both decoder heads fused into one MXU pass over the packed weight slab.
    logits = jnp.dot(h.astype(wh_ref.dtype), wh_ref[...],
                     preferred_element_type=jnp.float32) + bh_ref[...]

    col = lax.broadcasted_iota(jnp.int32, logits.shape, 1)
    is_t1 = col < o1

    # Task 1: softmax as a masked reduction over the first o1 lanes.
    masked = jnp.where(is_t1, logits, -jnp.inf)
    m = jnp.max(masked, axis=1, keepdims=True)            # always a real logit
    e = jnp.exp(masked - m)                                # non-task1 lanes -> 0
    y1 = e / jnp.sum(e, axis=1, keepdims=True)             # exact reciprocal

    # Task 2: sigmoid via tanh (single EUP op, no overflow path). Computed on
    # the whole slab; only lanes [o1, o1+o2) are kept by the select/wrapper.
    y2 = 0.5 * (jnp.tanh(0.5 * logits) + 1.0)

    # Single lane-dense store of the packed result.
    o_ref[...] = jnp.where(is_t1, y1, y2).astype(o_ref.dtype)


def multitask_forward(x, params, *, compute_dtype=jnp.bfloat16, tb=None):
    """x: [B, input_size] f32. params: dict of weights/biases. Returns [y1, y2]."""
    w1, b1 = params["w1"], params["b1"].astype(jnp.float32)
    wa, ba = params["wa"], params["ba"]
    wb, bb = params["wb"], params["bb"]

    B, IN = x.shape
    H = w1.shape[1]
    o1, o2 = wa.shape[1], wb.shape[1]
    assert o1 >= 1 and o2 >= 1, "both heads must have at least one output"

    # ---- pack both heads into one lane-dense [H, round_up(o1+o2,128)] slab ----
    out_w = _round_up(o1 + o2, 128)
    wh = jnp.zeros((H, out_w), jnp.float32).at[:, :o1].set(wa).at[:, o1:o1 + o2].set(wb)
    bh = jnp.zeros((1, out_w), jnp.float32).at[:, :o1].set(ba).at[:, o1:o1 + o2].set(bb)

    # ---- bf16 stream / resident weights, f32 biases + accumulation ----
    x_c = x.astype(compute_dtype)
    w1_c = w1.astype(compute_dtype)
    wh_c = wh.astype(compute_dtype)
    wdt = jnp.dtype(compute_dtype).itemsize

    # ---- per-generation VMEM budget ----
    try:
        vmem_cap = pltpu.get_tpu_info().vmem_capacity_bytes
    except Exception:
        vmem_cap = 64 * 1024 * 1024
    big_vmem = vmem_cap >= 128 * 1024 * 1024            # v5e/v6e vs v7x
    vmem_limit = (64 if big_vmem else 48) * 1024 * 1024

    weight_bytes = (IN * H + H * out_w) * wdt + (H + out_w) * 4
    # TODO(synk): when resident weights approach the VMEM limit (large IN/H),
    # add a K grid axis over IN with an f32 VMEM accumulator instead of
    # keeping w1 fully resident.
    if 2 * weight_bytes > vmem_limit:
        raise ValueError("resident weights exceed VMEM budget; K-tiling needed")

    if tb is None:
        # Budget: double-buffered x/out tiles + f32 intermediates (h, logits,
        # e, y1, y2, select) on top of the resident weights.
        per_row = 2 * IN * wdt + 2 * out_w * 4 + (H + 6 * out_w) * 4
        tb = max(8, (vmem_limit - 2 * weight_bytes) // max(per_row, 1))
        tb = max(8, (tb // 8) * 8)
        tb = min(tb, 2048 if big_vmem else 1024)

    # ---- batch tiling: >=4 grid steps for large B (megacore + pipelining) ----
    if B <= tb and B <= 512:
        TB, Bp = B, B
    else:
        TB = min(tb, max(256, _round_up(_cdiv(B, 4), 8)))
        TB = max(8, (TB // 8) * 8)
        Bp = _round_up(B, TB)
    if Bp != B:
        x_c = jnp.pad(x_c, ((0, Bp - B), (0, 0)))
    grid = (Bp // TB,)

    cost = pl.CostEstimate(
        flops=2 * Bp * (IN * H + H * out_w),
        transcendentals=2 * Bp * out_w,
        bytes_accessed=Bp * IN * wdt + weight_bytes + Bp * out_w * 4,
    )

    def _run(single_buffer_weights):
        res_kw = {"pipeline_mode": pl.Buffered(1)} if single_buffer_weights else {}
        in_specs = [
            pl.BlockSpec((TB, IN), lambda i: (i, 0)),               # x: streams over batch
            pl.BlockSpec((IN, H), lambda i: (0, 0), **res_kw),      # encoder weight: resident
            pl.BlockSpec((1, H), lambda i: (0, 0), **res_kw),       # encoder bias
            pl.BlockSpec((H, out_w), lambda i: (0, 0), **res_kw),   # fused head weight
            pl.BlockSpec((1, out_w), lambda i: (0, 0), **res_kw),   # fused head bias
        ]
        return pl.pallas_call(
            functools.partial(_multitask_kernel, o1=o1),
            out_shape=jax.ShapeDtypeStruct((Bp, out_w), jnp.float32),
            grid=grid,
            in_specs=in_specs,
            out_specs=pl.BlockSpec((TB, out_w), lambda i: (i, 0)),
            compiler_params=pltpu.CompilerParams(
                dimension_semantics=("parallel",),     # megacore sharding on v7x
                vmem_limit_bytes=vmem_limit,
            ),
            cost_estimate=cost,
        )(x_c, w1_c, b1, wh_c, bh)

    try:
        out = _run(True)                  # single-buffered resident weights
    except Exception:
        out = _run(False)                 # fallback: default double-buffering

    y1 = out[:B, :o1]
    y2 = out[:B, o1:o1 + o2]
    return [y1, y2]


def init_params(key, input_size, hidden_size, output_sizes):
    """Deterministic synthetic init (uniform, like PyTorch's nn.Linear default)."""
    ks = jax.random.split(key, 6)

    def lin(kw, kb, fan_in, fan_out):
        bound = 1.0 / jnp.sqrt(fan_in)
        w = jax.random.uniform(kw, (fan_in, fan_out), jnp.float32, -bound, bound)
        b = jax.random.uniform(kb, (1, fan_out), jnp.float32, -bound, bound)
        return w, b

    w1, b1 = lin(ks[0], ks[1], input_size, hidden_size)
    wa, ba = lin(ks[2], ks[3], hidden_size, output_sizes[0])
    wb, bb = lin(ks[4], ks[5], hidden_size, output_sizes[1])
    return {"w1": w1, "b1": b1, "wa": wa, "ba": ba, "wb": wb, "bb": bb}


if __name__ == "__main__":
    # Small shapes consistent with the module: x is [batch, input_size].
    batch, input_size, hidden_size = 8, 32, 64
    output_sizes = (16, 8)

    key = jax.random.PRNGKey(0)
    kx, kp = jax.random.split(key)
    x = jax.random.normal(kx, (batch, input_size), jnp.float32)
    params = init_params(kp, input_size, hidden_size, output_sizes)

    y1, y2 = multitask_forward(x, params)
    jax.block_until_ready(y1)
    jax.block_until_ready(y2)
    assert y1.shape == (batch, output_sizes[0]) and y2.shape == (batch, output_sizes[1])

    # Reference 1: same math with matched bf16 casts (tight tolerance).
    bf16 = jnp.bfloat16
    h_b = jnp.maximum(
        jnp.dot(x.astype(bf16), params["w1"].astype(bf16),
                preferred_element_type=jnp.float32) + params["b1"], 0.0).astype(bf16)
    l1_b = jnp.dot(h_b, params["wa"].astype(bf16),
                   preferred_element_type=jnp.float32) + params["ba"]
    l2_b = jnp.dot(h_b, params["wb"].astype(bf16),
                   preferred_element_type=jnp.float32) + params["bb"]
    assert jnp.allclose(y1, jax.nn.softmax(l1_b, axis=1), atol=2e-3), "task1 softmax mismatch"
    assert jnp.allclose(y2, jax.nn.sigmoid(l2_b), atol=2e-3), "task2 sigmoid mismatch"

    # Reference 2: pure f32 math (loose tolerance, accounts for bf16 rounding).
    h_f = jnp.maximum(x @ params["w1"] + params["b1"], 0.0)
    y1_f = jax.nn.softmax(h_f @ params["wa"] + params["ba"], axis=1)
    y2_f = jax.nn.sigmoid(h_f @ params["wb"] + params["bb"])
    assert jnp.allclose(y1, y1_f, atol=5e-2), "task1 f32 sanity mismatch"
    assert jnp.allclose(y2, y2_f, atol=5e-2), "task2 f32 sanity mismatch"

    print("KERNEL_OK")
</pallas_src>

<mosaic_0001>
module attributes {stable_mosaic.version = 11 : i64} {
  func.func @_multitask_kernel(%arg0: i32, %arg1: memref<8x32xbf16, #tpu.memory_space<vmem>>, %arg2: memref<32x64xbf16, #tpu.memory_space<vmem>>, %arg3: memref<1x64xf32, #tpu.memory_space<vmem>>, %arg4: memref<64x128xbf16, #tpu.memory_space<vmem>>, %arg5: memref<1x128xf32, #tpu.memory_space<vmem>>, %arg6: memref<8x128xf32, #tpu.memory_space<vmem>>) attributes {dimension_semantics = [#tpu.dimension_semantics<parallel>], iteration_bounds = array<i64: 1>, scalar_prefetch = 0 : i64, scratch_operands = 0 : i64, tpu.core_type = #tpu.core_type<tc>, window_params = [{transform_indices = @transform_0, window_bounds = array<i64: 8, 32>}, {pipeline_mode = #tpu.pipeline_mode<synchronous>, transform_indices = @transform_1, window_bounds = array<i64: 32, 64>}, {pipeline_mode = #tpu.pipeline_mode<synchronous>, transform_indices = @transform_2, window_bounds = array<i64: 1, 64>}, {pipeline_mode = #tpu.pipeline_mode<synchronous>, transform_indices = @transform_3, window_bounds = array<i64: 64, 128>}, {pipeline_mode = #tpu.pipeline_mode<synchronous>, transform_indices = @transform_4, window_bounds = array<i64: 1, 128>}, {transform_indices = @transform_5, window_bounds = array<i64: 8, 128>}]} {
    %c0 = arith.constant 0 : index
    %c0_0 = arith.constant 0 : index
    %0 = vector.load %arg1[%c0, %c0_0] : memref<8x32xbf16, #tpu.memory_space<vmem>>, vector<8x32xbf16>
    %c0_1 = arith.constant 0 : index
    %c0_2 = arith.constant 0 : index
    %1 = vector.load %arg2[%c0_1, %c0_2] : memref<32x64xbf16, #tpu.memory_space<vmem>>, vector<32x64xbf16>
    %cst = arith.constant dense<0.000000e+00> : vector<8x64xf32>
    %2 = tpu.matmul %0, %1, %cst {dimension_numbers = #tpu.dot_dimension_numbers<[1], [0], [0], [1], [0, 0, 1, 1], [], []>} : vector<8x32xbf16>, vector<32x64xbf16>, vector<8x64xf32> -> vector<8x64xf32>
    %c0_3 = arith.constant 0 : index
    %c0_4 = arith.constant 0 : index
    %3 = vector.load %arg3[%c0_3, %c0_4] : memref<1x64xf32, #tpu.memory_space<vmem>>, vector<1x64xf32>
    %4 = vector.broadcast %3 : vector<1x64xf32> to vector<8x64xf32>
    %5 = arith.addf %2, %4 : vector<8x64xf32>
    %cst_5 = arith.constant 0.000000e+00 : f32
    %6 = vector.broadcast %cst_5 : f32 to vector<8x64xf32>
    %7 = arith.maximumf %5, %6 : vector<8x64xf32>
    %8 = arith.truncf %7 : vector<8x64xf32> to vector<8x64xbf16>
    %c0_6 = arith.constant 0 : index
    %c0_7 = arith.constant 0 : index
    %9 = vector.load %arg4[%c0_6, %c0_7] : memref<64x128xbf16, #tpu.memory_space<vmem>>, vector<64x128xbf16>
    %cst_8 = arith.constant dense<0.000000e+00> : vector<8x128xf32>
    %10 = tpu.matmul %8, %9, %cst_8 {dimension_numbers = #tpu.dot_dimension_numbers<[1], [0], [0], [1], [0, 0, 1, 1], [], []>} : vector<8x64xbf16>, vector<64x128xbf16>, vector<8x128xf32> -> vector<8x128xf32>
    %c0_9 = arith.constant 0 : index
    %c0_10 = arith.constant 0 : index
    %11 = vector.load %arg5[%c0_9, %c0_10] : memref<1x128xf32, #tpu.memory_space<vmem>>, vector<1x128xf32>
    %12 = vector.broadcast %11 : vector<1x128xf32> to vector<8x128xf32>
    %13 = arith.addf %10, %12 : vector<8x128xf32>
    %14 = tpu.iota {dimensions = array<i32: 1>} : vector<8x128xi32>
    %c16_i32 = arith.constant 16 : i32
    %15 = vector.broadcast %c16_i32 : i32 to vector<8x128xi32>
    %16 = arith.cmpi slt, %14, %15 : vector<8x128xi32>
    %cst_11 = arith.constant 0xFF800000 : f32
    %17 = vector.broadcast %cst_11 : f32 to vector<8x128xf32>
    %18 = arith.select %16, %13, %17 : vector<8x128xi1>, vector<8x128xf32>
    %cst_12 = arith.constant dense<0xFF800000> : vector<8xf32>
    %19 = vector.multi_reduction <maximumf>, %18, %cst_12 [1] : vector<8x128xf32> to vector<8xf32>
    %20 = vector.shape_cast %19 : vector<8xf32> to vector<8x1xf32>
    %21 = vector.broadcast %20 : vector<8x1xf32> to vector<8x128xf32>
    %22 = arith.subf %18, %21 : vector<8x128xf32>
    %23 = math.exp %22 : vector<8x128xf32>
    %cst_13 = arith.constant dense<0.000000e+00> : vector<8xf32>
    %24 = vector.multi_reduction <add>, %23, %cst_13 [1] : vector<8x128xf32> to vector<8xf32>
    %25 = vector.shape_cast %24 : vector<8xf32> to vector<8x1xf32>
    %26 = vector.broadcast %25 : vector<8x1xf32> to vector<8x128xf32>
    %27 = arith.divf %23, %26 : vector<8x128xf32>
    %cst_14 = arith.constant 5.000000e-01 : f32
    %28 = vector.broadcast %cst_14 : f32 to vector<8x128xf32>
    %29 = arith.mulf %28, %13 : vector<8x128xf32>
    %30 = math.tanh %29 : vector<8x128xf32>
    %cst_15 = arith.constant 1.000000e+00 : f32
    %31 = vector.broadcast %cst_15 : f32 to vector<8x128xf32>
    %32 = arith.addf %30, %31 : vector<8x128xf32>
    %cst_16 = arith.constant 5.000000e-01 : f32
    %33 = vector.broadcast %cst_16 : f32 to vector<8x128xf32>
    %34 = arith.mulf %33, %32 : vector<8x128xf32>
    %35 = arith.select %16, %27, %34 : vector<8x128xi1>, vector<8x128xf32>
    %c0_17 = arith.constant 0 : index
    %c0_18 = arith.constant 0 : index
    %36 = vector.load %arg6[%c0_17, %c0_18] : memref<8x128xf32, #tpu.memory_space<vmem>>, vector<8x128xf32>
    tpu.vector_store %arg6[%c0_17, %c0_18], %35 {strides = array<i32>} : memref<8x128xf32, #tpu.memory_space<vmem>>, vector<8x128xf32>,
    return
  }
  func.func @transform_0(%arg0: i32) -> (i32, i32) {
    %c0_i32 = arith.constant 0 : i32
    %c0_i32_0 = arith.constant 0 : i32
    return %arg0, %c0_i32 : i32, i32
  }
  func.func @transform_1(%arg0: i32) -> (i32, i32) {
    %c0_i32 = arith.constant 0 : i32
    %c0_i32_0 = arith.constant 0 : i32
    %c0_i32_1 = arith.constant 0 : i32
    return %c0_i32, %c0_i32_0 : i32, i32
  }
  func.func @transform_2(%arg0: i32) -> (i32, i32) {
    %c0_i32 = arith.constant 0 : i32
    %c0_i32_0 = arith.constant 0 : i32
    %c0_i32_1 = arith.constant 0 : i32
    return %c0_i32, %c0_i32_0 : i32, i32
  }
  func.func @transform_3(%arg0: i32) -> (i32, i32) {
    %c0_i32 = arith.constant 0 : i32
    %c0_i32_0 = arith.constant 0 : i32
    %c0_i32_1 = arith.constant 0 : i32
    return %c0_i32, %c0_i32_0 : i32, i32
  }
  func.func @transform_4(%arg0: i32) -> (i32, i32) {
    %c0_i32 = arith.constant 0 : i32
    %c0_i32_0 = arith.constant 0 : i32
    %c0_i32_1 = arith.constant 0 : i32
    return %c0_i32, %c0_i32_0 : i32, i32
  }
  func.func @transform_5(%arg0: i32) -> (i32, i32) {
    %c0_i32 = arith.constant 0 : i32
    %c0_i32_0 = arith.constant 0 : i32
    return %arg0, %c0_i32 : i32, i32
  }
}

module attributes {stable_mosaic.version = 11 : i64} {
  func.func @_multitask_kernel(%arg0: i32, %arg1: memref<8x32xbf16, #tpu.memory_space<vmem>>, %arg2: memref<32x64xbf16, #tpu.memory_space<vmem>>, %arg3: memref<1x64xf32, #tpu.memory_space<vmem>>, %arg4: memref<64x128xbf16, #tpu.memory_space<vmem>>, %arg5: memref<1x128xf32, #tpu.memory_space<vmem>>, %arg6: memref<8x128xf32, #tpu.memory_space<vmem>>) attributes {dimension_semantics = [#tpu.dimension_semantics<parallel>], iteration_bounds = array<i64: 1>, scalar_prefetch = 0 : i64, scratch_operands = 0 : i64, tpu.core_type = #tpu.core_type<tc>, window_params = [{transform_indices = @transform_0, window_bounds = array<i64: 8, 32>}, {pipeline_mode = #tpu.pipeline_mode<synchronous>, transform_indices = @transform_1, window_bounds = array<i64: 32, 64>}, {pipeline_mode = #tpu.pipeline_mode<synchronous>, transform_indices = @transform_2, window_bounds = array<i64: 1, 64>}, {pipeline_mode = #tpu.pipeline_mode<synchronous>, transform_indices = @transform_3, window_bounds = array<i64: 64, 128>}, {pipeline_mode = #tpu.pipeline_mode<synchronous>, transform_indices = @transform_4, window_bounds = array<i64: 1, 128>}, {transform_indices = @transform_5, window_bounds = array<i64: 8, 128>}]} {
    %c0 = arith.constant 0 : index
    %c0_0 = arith.constant 0 : index
    %0 = vector.load %arg1[%c0, %c0_0] : memref<8x32xbf16, #tpu.memory_space<vmem>>, vector<8x32xbf16>
    %c0_1 = arith.constant 0 : index
    %c0_2 = arith.constant 0 : index
    %1 = vector.load %arg2[%c0_1, %c0_2] : memref<32x64xbf16, #tpu.memory_space<vmem>>, vector<32x64xbf16>
    %cst = arith.constant dense<0.000000e+00> : vector<8x64xf32>
    %2 = tpu.matmul %0, %1, %cst {dimension_numbers = #tpu.dot_dimension_numbers<[1], [0], [0], [1], [0, 0, 1, 1], [], []>} : vector<8x32xbf16>, vector<32x64xbf16>, vector<8x64xf32> -> vector<8x64xf32>
    %c0_3 = arith.constant 0 : index
    %c0_4 = arith.constant 0 : index
    %3 = vector.load %arg3[%c0_3, %c0_4] : memref<1x64xf32, #tpu.memory_space<vmem>>, vector<1x64xf32>
    %4 = vector.broadcast %3 : vector<1x64xf32> to vector<8x64xf32>
    %5 = arith.addf %2, %4 : vector<8x64xf32>
    %cst_5 = arith.constant 0.000000e+00 : f32
    %6 = vector.broadcast %cst_5 : f32 to vector<8x64xf32>
    %7 = arith.maximumf %5, %6 : vector<8x64xf32>
    %8 = arith.truncf %7 : vector<8x64xf32> to vector<8x64xbf16>
    %c0_6 = arith.constant 0 : index
    %c0_7 = arith.constant 0 : index
    %9 = vector.load %arg4[%c0_6, %c0_7] : memref<64x128xbf16, #tpu.memory_space<vmem>>, vector<64x128xbf16>
    %cst_8 = arith.constant dense<0.000000e+00> : vector<8x128xf32>
    %10 = tpu.matmul %8, %9, %cst_8 {dimension_numbers = #tpu.dot_dimension_numbers<[1], [0], [0], [1], [0, 0, 1, 1], [], []>} : vector<8x64xbf16>, vector<64x128xbf16>, vector<8x128xf32> -> vector<8x128xf32>
    %c0_9 = arith.constant 0 : index
    %c0_10 = arith.constant 0 : index
    %11 = vector.load %arg5[%c0_9, %c0_10] : memref<1x128xf32, #tpu.memory_space<vmem>>, vector<1x128xf32>
    %12 = vector.broadcast %11 : vector<1x128xf32> to vector<8x128xf32>
    %13 = arith.addf %10, %12 : vector<8x128xf32>
    %14 = tpu.iota {dimensions = array<i32: 1>} : vector<8x128xi32>
    %c16_i32 = arith.constant 16 : i32
    %15 = vector.broadcast %c16_i32 : i32 to vector<8x128xi32>
    %16 = arith.cmpi slt, %14, %15 : vector<8x128xi32>
    %cst_11 = arith.constant 0xFF800000 : f32
    %17 = vector.broadcast %cst_11 : f32 to vector<8x128xf32>
    %18 = arith.select %16, %13, %17 : vector<8x128xi1>, vector<8x128xf32>
    %cst_12 = arith.constant dense<0xFF800000> : vector<8xf32>
    %19 = vector.multi_reduction <maximumf>, %18, %cst_12 [1] : vector<8x128xf32> to vector<8xf32>
    %20 = vector.shape_cast %19 : vector<8xf32> to vector<8x1xf32>
    %21 = vector.broadcast %20 : vector<8x1xf32> to vector<8x128xf32>
    %22 = arith.subf %18, %21 : vector<8x128xf32>
    %23 = math.exp %22 : vector<8x128xf32>
    %cst_13 = arith.constant dense<0.000000e+00> : vector<8xf32>
    %24 = vector.multi_reduction <add>, %23, %cst_13 [1] : vector<8x128xf32> to vector<8xf32>
    %25 = vector.shape_cast %24 : vector<8xf32> to vector<8x1xf32>
    %26 = vector.broadcast %25 : vector<8x1xf32> to vector<8x128xf32>
    %27 = arith.divf %23, %26 : vector<8x128xf32>
    %cst_14 = arith.constant 5.000000e-01 : f32
    %28 = vector.broadcast %cst_14 : f32 to vector<8x128xf32>
    %29 = arith.mulf %28, %13 : vector<8x128xf32>
    %30 = math.tanh %29 : vector<8x128xf32>
    %cst_15 = arith.constant 1.000000e+00 : f32
    %31 = vector.broadcast %cst_15 : f32 to vector<8x128xf32>
    %32 = arith.addf %30, %31 : vector<8x128xf32>
    %cst_16 = arith.constant 5.000000e-01 : f32
    %33 = vector.broadcast %cst_16 : f32 to vector<8x128xf32>
    %34 = arith.mulf %33, %32 : vector<8x128xf32>
    %35 = arith.select %16, %27, %34 : vector<8x128xi1>, vector<8x128xf32>
    %c0_17 = arith.constant 0 : index
    %c0_18 = arith.constant 0 : index
    %36 = vector.load %arg6[%c0_17, %c0_18] : memref<8x128xf32, #tpu.memory_space<vmem>>, vector<8x128xf32>
    tpu.vector_store %arg6[%c0_17, %c0_18], %35 {strides = array<i32>} : memref<8x128xf32, #tpu.memory_space<vmem>>, vector<8x128xf32>,
    return
  }
  func.func @transform_0(%arg0: i32) -> (i32, i32) {
    %c0_i32 = arith.constant 0 : i32
    %c0_i32_0 = arith.constant 0 : i32
    return %arg0, %c0_i32 : i32, i32
  }
  func.func @transform_1(%arg0: i32) -> (i32, i32) {
    %c0_i32 = arith.constant 0 : i32
    %c0_i32_0 = arith.constant 0 : i32
    %c0_i32_1 = arith.constant 0 : i32
    return %c0_i32, %c0_i32_0 : i32, i32
  }
  func.func @transform_2(%arg0: i32) -> (i32, i32) {
    %c0_i32 = arith.constant 0 : i32
    %c0_i32_0 = arith.constant 0 : i32
    %c0_i32_1 = arith.constant 0 : i32
    return %c0_i32, %c0_i32_0 : i32, i32
  }
  func.func @transform_3(%arg0: i32) -> (i32, i32) {
    %c0_i32 = arith.constant 0 : i32
    %c0_i32_0 = arith.constant 0 : i32
    %c0_i32_1 = arith.constant 0 : i32
    return %c0_i32, %c0_i32_0 : i32, i32
  }
  func.func @transform_4(%arg0: i32) -> (i32, i32) {
    %c0_i32 = arith.constant 0 : i32
    %c0_i32_0 = arith.constant 0 : i32
    %c0_i32_1 = arith.constant 0 : i32
    return %c0_i32, %c0_i32_0 : i32, i32
  }
  func.func @transform_5(%arg0: i32) -> (i32, i32) {
    %c0_i32 = arith.constant 0 : i32
    %c0_i32_0 = arith.constant 0 : i32
    return %arg0, %c0_i32 : i32, i32
  }
}

</mosaic_0001>

<bundles_post_ra>
// kernel: tpu_custom_call.1
= control target key start
LH: loop header
LB: loop body
LE: loop exit
PB: predicated region body
PF: predicated region fallthrough
CT: control target
= control target key end

     0   :  { %10 = vsyncpa [#allocation3], 0  ;;  %s414_s0 = inlined_call_operand.hbm [shape: bf16[8,32], index: 0, kind: input, shape index: {}]   ;;  %s415_s1 = inlined_call_operand.hbm [shape: bf16[32,64], index: 1, kind: input, shape index: {}]   ;;  %s416_s2 = inlined_call_operand.vmem [shape: f32[1,64], index: 2, kind: input, shape index: {}]   ;;  %s417_s3 = inlined_call_operand.hbm [shape: bf16[64,128], index: 3, kind: input, shape index: {}]   ;;  %s418_s4 = inlined_call_operand.vmem [shape: f32[1,128], index: 4, kind: input, shape index: {}]   ;;  %s419_s5 = inlined_call_operand.hbm [shape: f32[8,128], index: 5, kind: output, shape index: {}]  }
   0x1   :  { %11 = vsyncpa [#allocation6], 0  ;;  %s28_s20 = sshll.u32 %s415_s1, 4  ;;  %s29_s20 = int_to_ptr.hbm [resolvable:$true] %s28_s20 }
   0x2   :  { %12 = vsyncpa [#allocation4], 0  ;;  %s358_s21 = smov [#allocation5]   ;;  %s18_s25 = sshll.u32 %s414_s0, 4  ;;  %s19_s25 = int_to_ptr.hbm [resolvable:$true] %s18_s25 }
   0x3   :  { %s30_s22 = sshll.u32 %s358_s21, 4  ;;  %s359_s26 = smov 64   ;;  %s31_s22 = int_to_ptr.vmem [resolvable:$true] %s30_s22 }
   0x4   :  { %s360_s27 = smov 4   ;;  %s361_s28 = smov [#allocation2]  }
   0x5   :  { %36 = dma.hbm_to_vmem [thread:$0]  %s29_s20, 256, %s31_s22, [#allocation6], %s359_s26, %s359_s26, %s360_s27  }
   0x6   :  { %s20_s29 = sshll.u32 %s361_s28, 4  ;;  %s43_s7 = sshll.u32 %s417_s3, 4  ;;  %s21_s29 = int_to_ptr.vmem [resolvable:$true] %s20_s29  ;;  %s44_s7 = int_to_ptr.hbm [resolvable:$true] %s43_s7 }
   0x7   :  { %23 = dma.hbm_to_vmem [thread:$0]  %s19_s25, 64, %s21_s29, [#allocation3]  }
   0x8   :  { %s362_s1 = smov [#allocation7]  }
   0x9   :  { %s45_s8 = sshll.u32 %s362_s1, 4  ;;  %s46_s8 = int_to_ptr.vmem [resolvable:$true] %s45_s8 }
   0xa   :  { %51 = dma.hbm_to_vmem [thread:$0]  %s44_s7, 512, %s46_s8, [#allocation6], %s359_s26, %s359_s26, %s360_s27  }
   0xb   :  { %352 = dma.done.wait [#allocation3], 64  }
   0xc   :  { %353 = vsyncadd [#allocation3], 4294967232 }
   0xd   :  { %354 = dma.done.wait [#allocation6], 768  }
   0xe   :  { %355 = vsyncadd [#allocation6], 4294966528  ;;  %v237_v0 = vld [vmem:[#allocation5 + $0x8] sm:$0xff]  ;;  %v236_v2 = vld [vmem:[#allocation5] sm:$0xff]  ;;  %vm88_vm0 = vcmask 261120   ;;  %vm143_vm1 = vcmask 523264   ;;  %v160_v13 = vlaneseq }
   0xf   :  { %v241_v1 = vld [vmem:[#allocation7 + $0x18] sm:$0xff]  ;;  %98 = vmatpush.bf16.msra.mxu0 %v237_v0  ;;  %v240_v3 = vld [vmem:[#allocation7 + $0x10] sm:$0xff]  ;;  %v67_v4 = vld [vmem:[#allocation2] sm:$0xf]  ;;  %s199_s13 = sshll.u32 %s419_s5, 4  ;;  %s200_s13 = int_to_ptr.hbm [resolvable:$true] %s199_s13 }
  0x10   :  { %151 = vmatpush.bf16.msra.mxu1 %v241_v1  ;;  %v239_v5 = vld [vmem:[#allocation7 + $0x8] sm:$0xff]  ;;  %v238_v6 = vld [vmem:[#allocation7] sm:$0xff]  ;;  %v161_v14 = vand.u32 127, %v160_v13 }
  0x11   :  { %v248_v7 = vld [vmem:[%s416_s2] ss:$0 sm:$0xff]  ;;  %s363_s2 = smov [#allocation8]  }
  0x12   :  { %v249_v15 = vld [vmem:[%s418_s4] ss:$0 sm:$0xff]  ;;  %vm162_vm2 = vcmp.lt.s32.totalorder %v161_v14, 16  ;;  %s197_s4 = sshll.u32 %s363_s2, 4  ;;  %s198_s4 = int_to_ptr.vmem [resolvable:$true] %s197_s4 }
  0x13   :  { %99 = vmatpush.bf16.msra.mxu0 %v236_v2 }
  0x14   :  { %152 = vmatpush.bf16.msra.mxu1 %v240_v3 }
  0x16   :  { %218 = vmatmul.msk.bf16.vlgmr.msra.gmra.mxu0 %vm88_vm0, %v67_v4 }
  0x18   :  { %153 = vmatpush.bf16.msra.mxu1 %v239_v5 }
  0x1c   :  { %154 = vmatpush.bf16.msra.mxu1 %v238_v6 }
  0x93   :  { %v101_v8 = vpop.f32.mrf.mxu0 }
  0x94   :  { %v102_v9 = vadd.f32 %v248_v7, %v101_v8 }
  0x96   :  { %v105_v10 = vmax.f32 %v102_v9, 0.0 }
  0x98   :  { %v106_v11 = vpack.c.bf16 %v105_v10, %v105_v10 }
  0x9a   :  { %235 = vmatmul.msk.bf16.vlgmr.msra.gmra.mxu1 %vm143_vm1, %v106_v11 }
  0x9b   :  { %v103_v12 = vpop.f32.mrf.mxu0 }
 0x117   :  { %v156_v16 = vpop.f32.mrf.mxu1 }
 0x118   :  { %v157_v17 = vadd.f32 %v249_v15, %v156_v16 }
 0x11a   :  { %v163_v18 = vsel %vm162_vm2, %v157_v17, -inf  ;;  %v186_v25 = vmul.f32 0.5, %v157_v17 }
 0x11b   :  { %164 = vmax.xlane.f32.xlu0 %v163_v18 }
 0x11f   :  { %v158_v19 = vpop.f32.mrf.mxu1 }
 0x18e   :  { %v165_v20 = vpop.xlane.xlu0 %164 }
 0x18f   :  { %v166_v21 = vsub.f32 %v163_v18, %v165_v20 }
 0x191   :  { %v167_v22 = vmul.f32 1.442695, %v166_v21 }
 0x193   :  { %250 = vpow2.f32 %v167_v22 }
 0x199   :  { %v251_v23 = vpop.eup %250 }
 0x19a   :  { %169 = vadd.xlane.f32.xlu0 %v251_v23 }
 0x20d   :  { %v170_v24 = vpop.xlane.xlu0 %169 }
 0x20e   :  { %252 = vrcp.f32 %v170_v24  ;;  %v182_v30 = vand.u32 2147483648, %v170_v24  ;;  %v180_v32 = vand.u32 2147483647, %v170_v24  ;;  %vm176_vm4 = vweird.f32 %v170_v24 }
 0x20f   :  { %254 = vtanh.f32 %v186_v25 }
 0x210   :  { %v183_v35 = vor.u32 1.1754944e-38, %v182_v30  ;;  %vm181_vm6 = vcmp.eq.f32.partialorder %v180_v32, 8.507059e+37 }
 0x214   :  { %v253_v26 = vpop.eup %252 }
 0x215   :  { %v172_v27 = vmul.f32 %v253_v26, %v170_v24  ;;  %v255_v29 = vpop.eup %254  ;;  %vm177_vm3 = vweird.f32 %v253_v26 }
 0x216   :  { %v188_v33 = vadd.f32 1.0, %v255_v29  ;;  %vm178_vm5 = vmor %vm176_vm4, %vm177_vm3 }
 0x217   :  { %v173_v28 = vsub.f32 1.0, %v172_v27 }
 0x218   :  { %v189_v38 = vmul.f32 0.5, %v188_v33 }
 0x219   :  { %v174_v31 = vmul.f32 %v253_v26, %v173_v28 }
 0x21b   :  { %v175_v34 = vadd.f32 %v253_v26, %v174_v31 }
 0x21d   :  { %v179_v36 = vsel %vm178_vm5, %v253_v26, %v175_v34 }
 0x21e   :  { %v184_v37 = vsel %vm181_vm6, %v183_v35, %v179_v36 }
 0x21f   :  { %v185_v39 = vmul.f32 %v251_v23, %v184_v37 }
 0x221   :  { %v190_v40 = vsel %vm162_vm2, %v185_v39, %v189_v38 }
 0x222   :  { %191 = vst [vmem:[#allocation8] sm:$0xff] %v190_v40 }
 0x223   :  { %202 = dma.vmem_to_hbm [thread:$0]  %s198_s4, 128, %s200_s13, [#allocation4]  }
 0x224   :  { %356 = dma.done.wait [#allocation4], 128  }
 0x225   :  { %357 = vsyncadd [#allocation4], 4294967168 }
 0x226   :  { %207 = vsyncpa [#allocation3], 1 }
 0x227   :  { %208 = vsyncpa [#allocation6], 1 }
 0x228   :  { %209 = vsyncpa [#allocation4], 1 }

// kernel: tpu_custom_call.1
= control target key start
LH: loop header
LB: loop body
LE: loop exit
PB: predicated region body
PF: predicated region fallthrough
CT: control target
= control target key end

     0   :  { %10 = vsyncpa [#allocation3], 0  ;;  %s414_s0 = inlined_call_operand.hbm [shape: bf16[8,32], index: 0, kind: input, shape index: {}]   ;;  %s415_s1 = inlined_call_operand.hbm [shape: bf16[32,64], index: 1, kind: input, shape index: {}]   ;;  %s416_s2 = inlined_call_operand.vmem [shape: f32[1,64], index: 2, kind: input, shape index: {}]   ;;  %s417_s3 = inlined_call_operand.hbm [shape: bf16[64,128], index: 3, kind: input, shape index: {}]   ;;  %s418_s4 = inlined_call_operand.vmem [shape: f32[1,128], index: 4, kind: input, shape index: {}]   ;;  %s419_s5 = inlined_call_operand.hbm [shape: f32[8,128], index: 5, kind: output, shape index: {}]  }
   0x1   :  { %11 = vsyncpa [#allocation6], 0  ;;  %s28_s20 = sshll.u32 %s415_s1, 4  ;;  %s29_s20 = int_to_ptr.hbm [resolvable:$true] %s28_s20 }
   0x2   :  { %12 = vsyncpa [#allocation4], 0  ;;  %s358_s21 = smov [#allocation5]   ;;  %s18_s25 = sshll.u32 %s414_s0, 4  ;;  %s19_s25 = int_to_ptr.hbm [resolvable:$true] %s18_s25 }
   0x3   :  { %s30_s22 = sshll.u32 %s358_s21, 4  ;;  %s359_s26 = smov 64   ;;  %s31_s22 = int_to_ptr.vmem [resolvable:$true] %s30_s22 }
   0x4   :  { %s360_s27 = smov 4   ;;  %s361_s28 = smov [#allocation2]  }
   0x5   :  { %36 = dma.hbm_to_vmem [thread:$0]  %s29_s20, 256, %s31_s22, [#allocation6], %s359_s26, %s359_s26, %s360_s27  }
   0x6   :  { %s20_s29 = sshll.u32 %s361_s28, 4  ;;  %s43_s7 = sshll.u32 %s417_s3, 4  ;;  %s21_s29 = int_to_ptr.vmem [resolvable:$true] %s20_s29  ;;  %s44_s7 = int_to_ptr.hbm [resolvable:$true] %s43_s7 }
   0x7   :  { %23 = dma.hbm_to_vmem [thread:$0]  %s19_s25, 64, %s21_s29, [#allocation3]  }
   0x8   :  { %s362_s1 = smov [#allocation7]  }
   0x9   :  { %s45_s8 = sshll.u32 %s362_s1, 4  ;;  %s46_s8 = int_to_ptr.vmem [resolvable:$true] %s45_s8 }
   0xa   :  { %51 = dma.hbm_to_vmem [thread:$0]  %s44_s7, 512, %s46_s8, [#allocation6], %s359_s26, %s359_s26, %s360_s27  }
   0xb   :  { %352 = dma.done.wait [#allocation3], 64  }
   0xc   :  { %353 = vsyncadd [#allocation3], 4294967232 }
   0xd   :  { %354 = dma.done.wait [#allocation6], 768  }
   0xe   :  { %355 = vsyncadd [#allocation6], 4294966528  ;;  %v237_v0 = vld [vmem:[#allocation5 + $0x8] sm:$0xff]  ;;  %v236_v2 = vld [vmem:[#allocation5] sm:$0xff]  ;;  %vm88_vm0 = vcmask 261120   ;;  %vm143_vm1 = vcmask 523264   ;;  %v160_v13 = vlaneseq }
   0xf   :  { %v241_v1 = vld [vmem:[#allocation7 + $0x18] sm:$0xff]  ;;  %98 = vmatpush.bf16.msra.mxu0 %v237_v0  ;;  %v240_v3 = vld [vmem:[#allocation7 + $0x10] sm:$0xff]  ;;  %v67_v4 = vld [vmem:[#allocation2] sm:$0xf]  ;;  %s199_s13 = sshll.u32 %s419_s5, 4  ;;  %s200_s13 = int_to_ptr.hbm [resolvable:$true] %s199_s13 }
  0x10   :  { %151 = vmatpush.bf16.msra.mxu1 %v241_v1  ;;  %v239_v5 = vld [vmem:[#allocation7 + $0x8] sm:$0xff]  ;;  %v238_v6 = vld [vmem:[#allocation7] sm:$0xff]  ;;  %v161_v14 = vand.u32 127, %v160_v13 }
  0x11   :  { %v248_v7 = vld [vmem:[%s416_s2] ss:$0 sm:$0xff]  ;;  %s363_s2 = smov [#allocation8]  }
  0x12   :  { %v249_v15 = vld [vmem:[%s418_s4] ss:$0 sm:$0xff]  ;;  %vm162_vm2 = vcmp.lt.s32.totalorder %v161_v14, 16  ;;  %s197_s4 = sshll.u32 %s363_s2, 4  ;;  %s198_s4 = int_to_ptr.vmem [resolvable:$true] %s197_s4 }
  0x13   :  { %99 = vmatpush.bf16.msra.mxu0 %v236_v2 }
  0x14   :  { %152 = vmatpush.bf16.msra.mxu1 %v240_v3 }
  0x16   :  { %218 = vmatmul.msk.bf16.vlgmr.msra.gmra.mxu0 %vm88_vm0, %v67_v4 }
  0x18   :  { %153 = vmatpush.bf16.msra.mxu1 %v239_v5 }
  0x1c   :  { %154 = vmatpush.bf16.msra.mxu1 %v238_v6 }
  0x93   :  { %v101_v8 = vpop.f32.mrf.mxu0 }
  0x94   :  { %v102_v9 = vadd.f32 %v248_v7, %v101_v8 }
  0x96   :  { %v105_v10 = vmax.f32 %v102_v9, 0.0 }
  0x98   :  { %v106_v11 = vpack.c.bf16 %v105_v10, %v105_v10 }
  0x9a   :  { %235 = vmatmul.msk.bf16.vlgmr.msra.gmra.mxu1 %vm143_vm1, %v106_v11 }
  0x9b   :  { %v103_v12 = vpop.f32.mrf.mxu0 }
 0x117   :  { %v156_v16 = vpop.f32.mrf.mxu1 }
 0x118   :  { %v157_v17 = vadd.f32 %v249_v15, %v156_v16 }
 0x11a   :  { %v163_v18 = vsel %vm162_vm2, %v157_v17, -inf  ;;  %v186_v25 = vmul.f32 0.5, %v157_v17 }
 0x11b   :  { %164 = vmax.xlane.f32.xlu0 %v163_v18 }
 0x11f   :  { %v158_v19 = vpop.f32.mrf.mxu1 }
 0x18e   :  { %v165_v20 = vpop.xlane.xlu0 %164 }
 0x18f   :  { %v166_v21 = vsub.f32 %v163_v18, %v165_v20 }
 0x191   :  { %v167_v22 = vmul.f32 1.442695, %v166_v21 }
 0x193   :  { %250 = vpow2.f32 %v167_v22 }
 0x199   :  { %v251_v23 = vpop.eup %250 }
 0x19a   :  { %169 = vadd.xlane.f32.xlu0 %v251_v23 }
 0x20d   :  { %v170_v24 = vpop.xlane.xlu0 %169 }
 0x20e   :  { %252 = vrcp.f32 %v170_v24  ;;  %v182_v30 = vand.u32 2147483648, %v170_v24  ;;  %v180_v32 = vand.u32 2147483647, %v170_v24  ;;  %vm176_vm4 = vweird.f32 %v170_v24 }
 0x20f   :  { %254 = vtanh.f32 %v186_v25 }
 0x210   :  { %v183_v35 = vor.u32 1.1754944e-38, %v182_v30  ;;  %vm181_vm6 = vcmp.eq.f32.partialorder %v180_v32, 8.507059e+37 }
 0x214   :  { %v253_v26 = vpop.eup %252 }
 0x215   :  { %v172_v27 = vmul.f32 %v253_v26, %v170_v24  ;;  %v255_v29 = vpop.eup %254  ;;  %vm177_vm3 = vweird.f32 %v253_v26 }
 0x216   :  { %v188_v33 = vadd.f32 1.0, %v255_v29  ;;  %vm178_vm5 = vmor %vm176_vm4, %vm177_vm3 }
 0x217   :  { %v173_v28 = vsub.f32 1.0, %v172_v27 }
 0x218   :  { %v189_v38 = vmul.f32 0.5, %v188_v33 }
 0x219   :  { %v174_v31 = vmul.f32 %v253_v26, %v173_v28 }
 0x21b   :  { %v175_v34 = vadd.f32 %v253_v26, %v174_v31 }
 0x21d   :  { %v179_v36 = vsel %vm178_vm5, %v253_v26, %v175_v34 }
 0x21e   :  { %v184_v37 = vsel %vm181_vm6, %v183_v35, %v179_v36 }
 0x21f   :  { %v185_v39 = vmul.f32 %v251_v23, %v184_v37 }
 0x221   :  { %v190_v40 = vsel %vm162_vm2, %v185_v39, %v189_v38 }
 0x222   :  { %191 = vst [vmem:[#allocation8] sm:$0xff] %v190_v40 }
 0x223   :  { %202 = dma.vmem_to_hbm [thread:$0]  %s198_s4, 128, %s200_s13, [#allocation4]  }
 0x224   :  { %356 = dma.done.wait [#allocation4], 128  }
 0x225   :  { %357 = vsyncadd [#allocation4], 4294967168 }
 0x226   :  { %207 = vsyncpa [#allocation3], 1 }
 0x227   :  { %208 = vsyncpa [#allocation6], 1 }
 0x228   :  { %209 = vsyncpa [#allocation4], 1 }

</bundles_post_ra>
